<compile_context>
chip_gen: v6e
topology: v6e:2x2x1
jax: 0.10.0
libtpu: 0.0.40
codegen_flags: <defaults>
</compile_context>

<pallas_src>
import functools

import jax
import jax.numpy as jnp
import numpy as np
from jax.experimental import pallas as pl
from jax.experimental.pallas import tpu as pltpu


def fcqv_kernel(x_ref, u_ref, w1_ref, b1_ref, w2_ref, b2_ref, w3t_ref, b3_ref,
                o_ref):
    x = x_ref[...]                               # [TB, input_dim]  (compute dtype)
    u = u_ref[...]                               # [TB, output_dim] (compute dtype)

    # input layer + relu (f32 accumulation regardless of input dtype)
    h1 = jnp.dot(x, w1_ref[...], preferred_element_type=jnp.float32) + b1_ref[...]
    h1 = jnp.maximum(h1, 0.0)                    # [TB, H0] f32

    # hidden layer 0 on cat(h1, u): single fused matmul against original W2
    cat = jnp.concatenate([h1.astype(u.dtype), u], axis=-1)   # [TB, H0+out_dim]
    h2 = jnp.dot(cat, w2_ref[...], preferred_element_type=jnp.float32) + b2_ref[...]
    h2 = jnp.maximum(h2, 0.0)                    # [TB, H1] f32

    # output layer (N=1): VPU multiply + lane reduce instead of a 1-column MXU matmul
    o_ref[...] = jnp.sum(h2 * w3t_ref[...], axis=-1, keepdims=True) + b3_ref[...]


def _pick_tile(B, tile_b):
    TB = min(B, tile_b)
    if TB != B:
        TB = max(8, (TB // 8) * 8)   # sublane-aligned tiles when not full-batch
    return TB


@functools.partial(jax.jit, static_argnames=("tile_b", "compute_dtype"))
def fcqv_forward(state, action, params, *, tile_b=2048,
                 compute_dtype=jnp.float32):
    w1, b1, w2, b2, w3t, b3 = params
    B, in_dim = state.shape
    out_dim = action.shape[1]
    h0 = w1.shape[1]
    h1d = w2.shape[1]

    cd = jnp.dtype(compute_dtype)
    state = state.astype(cd)
    action = action.astype(cd)
    w1 = w1.astype(cd)
    w2 = w2.astype(cd)
    # biases, w3 row and all elementwise math stay f32 (v5e VPU has no bf16)

    TB = _pick_tile(B, tile_b)
    grid = (pl.cdiv(B, TB),)

    def row_spec(feat):
        # streamed per-batch tile
        return pl.BlockSpec((TB, feat), lambda i: (i, 0))

    def const_spec(arr):
        # VMEM-resident weights: constant block index => fetched once, no re-DMA
        return pl.BlockSpec(arr.shape, lambda i: (0, 0))

    flops = 2 * B * (in_dim * h0 + (h0 + out_dim) * h1d + h1d)
    bytes_accessed = int(
        B * (in_dim + out_dim) * cd.itemsize            # streamed inputs
        + B * 4                                         # f32 output
        + sum(int(np.prod(a.shape)) * a.dtype.itemsize  # resident weights/biases
              for a in (w1, b1, w2, b2, w3t, b3)))

    return pl.pallas_call(
        fcqv_kernel,
        out_shape=jax.ShapeDtypeStruct((B, 1), jnp.float32),
        grid=grid,
        in_specs=[
            row_spec(in_dim),     # state
            row_spec(out_dim),    # action
            const_spec(w1),
            const_spec(b1),
            const_spec(w2),
            const_spec(b2),
            const_spec(w3t),
            const_spec(b3),
        ],
        out_specs=row_spec(1),
        compiler_params=pltpu.CompilerParams(
            dimension_semantics=("parallel",),
            vmem_limit_bytes=32 * 1024 * 1024,
        ),
        cost_estimate=pl.CostEstimate(
            flops=flops, transcendentals=0, bytes_accessed=bytes_accessed),
    )(state, action, w1, b1, w2, b2, w3t, b3)


def init_params(key, input_dim, output_dim, hidden_dims=(32, 32)):
    """PyTorch-nn.Linear-style init (uniform +-1/sqrt(fan_in)).
    Weights stored [in, out]; biases [1, out]; output weight stored as a [1, H1] row."""
    h0, h1 = hidden_dims
    ks = jax.random.split(key, 6)

    def lin(kw, kb, fan_in, fan_out):
        bound = 1.0 / np.sqrt(fan_in)
        w = jax.random.uniform(kw, (fan_in, fan_out), jnp.float32, -bound, bound)
        b = jax.random.uniform(kb, (1, fan_out), jnp.float32, -bound, bound)
        return w, b

    w1, b1 = lin(ks[0], ks[1], input_dim, h0)                 # input_layer
    w2, b2 = lin(ks[2], ks[3], h0 + output_dim, h1)           # hidden_layers[0] (cat dim)
    w3, b3 = lin(ks[4], ks[5], h1, 1)                         # output_layer
    w3t = w3.T                                                # [1, H1] row for VPU reduce
    return (w1, b1, w2, b2, w3t, b3)


def fcqv_reference(state, action, params):
    w1, b1, w2, b2, w3t, b3 = params
    h1 = jnp.maximum(state @ w1 + b1, 0.0)
    cat = jnp.concatenate([h1, action], axis=1)
    h2 = jnp.maximum(cat @ w2 + b2, 0.0)
    return h2 @ w3t.T + b3


if __name__ == "__main__":
    input_dim, output_dim = 8, 4
    key = jax.random.PRNGKey(0)
    k_state, k_action, k_params = jax.random.split(key, 3)
    params = init_params(k_params, input_dim, output_dim, hidden_dims=(32, 32))

    # --- test 1: tiny batch, single grid step, f32, tight tolerance ---
    B = 8
    state = jax.random.normal(k_state, (B, input_dim), jnp.float32)
    action = jax.random.normal(k_action, (B, output_dim), jnp.float32)
    out = jax.block_until_ready(fcqv_forward(state, action, params))
    ref = fcqv_reference(state, action, params)
    assert out.shape == (B, 1)
    np.testing.assert_allclose(np.asarray(out), np.asarray(ref),
                               rtol=1e-5, atol=1e-5)

    # --- test 2: multi-step batch grid (exercises the streaming pipeline) ---
    B2 = 64
    state2 = jax.random.normal(jax.random.fold_in(k_state, 1), (B2, input_dim), jnp.float32)
    action2 = jax.random.normal(jax.random.fold_in(k_action, 1), (B2, output_dim), jnp.float32)
    out2 = jax.block_until_ready(fcqv_forward(state2, action2, params, tile_b=16))
    ref2 = fcqv_reference(state2, action2, params)
    np.testing.assert_allclose(np.asarray(out2), np.asarray(ref2),
                               rtol=1e-5, atol=1e-5)

    # --- test 3: bf16 streaming path (f32 accumulation), loose tolerance ---
    out3 = jax.block_until_ready(
        fcqv_forward(state2, action2, params, tile_b=16,
                     compute_dtype=jnp.bfloat16))
    np.testing.assert_allclose(np.asarray(out3), np.asarray(ref2),
                               rtol=5e-2, atol=5e-2)

    print("KERNEL_OK")
</pallas_src>

<mosaic_0001>
module attributes {stable_mosaic.version = 11 : i64} {
  func.func @fcqv_kernel(%arg0: i32, %arg1: memref<8x8xf32, #tpu.memory_space<vmem>>, %arg2: memref<8x4xf32, #tpu.memory_space<vmem>>, %arg3: memref<8x32xf32, #tpu.memory_space<vmem>>, %arg4: memref<1x32xf32, #tpu.memory_space<vmem>>, %arg5: memref<36x32xf32, #tpu.memory_space<vmem>>, %arg6: memref<1x32xf32, #tpu.memory_space<vmem>>, %arg7: memref<1x32xf32, #tpu.memory_space<vmem>>, %arg8: memref<1x1xf32, #tpu.memory_space<vmem>>, %arg9: memref<8x1xf32, #tpu.memory_space<vmem>>) attributes {dimension_semantics = [#tpu.dimension_semantics<parallel>], iteration_bounds = array<i64: 1>, scalar_prefetch = 0 : i64, scratch_operands = 0 : i64, tpu.core_type = #tpu.core_type<tc>, window_params = [{transform_indices = @transform_0, window_bounds = array<i64: 8, 8>}, {transform_indices = @transform_1, window_bounds = array<i64: 8, 4>}, {pipeline_mode = #tpu.pipeline_mode<synchronous>, transform_indices = @transform_2, window_bounds = array<i64: 8, 32>}, {pipeline_mode = #tpu.pipeline_mode<synchronous>, transform_indices = @transform_3, window_bounds = array<i64: 1, 32>}, {pipeline_mode = #tpu.pipeline_mode<synchronous>, transform_indices = @transform_4, window_bounds = array<i64: 36, 32>}, {pipeline_mode = #tpu.pipeline_mode<synchronous>, transform_indices = @transform_5, window_bounds = array<i64: 1, 32>}, {pipeline_mode = #tpu.pipeline_mode<synchronous>, transform_indices = @transform_6, window_bounds = array<i64: 1, 32>}, {pipeline_mode = #tpu.pipeline_mode<synchronous>, transform_indices = @transform_7, window_bounds = array<i64: 1, 1>}, {transform_indices = @transform_8, window_bounds = array<i64: 8, 1>}]} {
    %c0 = arith.constant 0 : index
    %c0_0 = arith.constant 0 : index
    %0 = vector.load %arg1[%c0, %c0_0] : memref<8x8xf32, #tpu.memory_space<vmem>>, vector<8x8xf32>
    %c0_1 = arith.constant 0 : index
    %c0_2 = arith.constant 0 : index
    %1 = vector.load %arg2[%c0_1, %c0_2] : memref<8x4xf32, #tpu.memory_space<vmem>>, vector<8x4xf32>
    %c0_3 = arith.constant 0 : index
    %c0_4 = arith.constant 0 : index
    %2 = vector.load %arg3[%c0_3, %c0_4] : memref<8x32xf32, #tpu.memory_space<vmem>>, vector<8x32xf32>
    %cst = arith.constant dense<0.000000e+00> : vector<8x32xf32>
    %3 = tpu.matmul %0, %2, %cst {dimension_numbers = #tpu.dot_dimension_numbers<[1], [0], [0], [1], [0, 0, 1, 1], [], []>} : vector<8x8xf32>, vector<8x32xf32>, vector<8x32xf32> -> vector<8x32xf32>
    %c0_5 = arith.constant 0 : index
    %c0_6 = arith.constant 0 : index
    %4 = vector.load %arg4[%c0_5, %c0_6] : memref<1x32xf32, #tpu.memory_space<vmem>>, vector<1x32xf32>
    %5 = vector.broadcast %4 : vector<1x32xf32> to vector<8x32xf32>
    %6 = arith.addf %3, %5 : vector<8x32xf32>
    %cst_7 = arith.constant 0.000000e+00 : f32
    %7 = vector.broadcast %cst_7 : f32 to vector<8x32xf32>
    %8 = arith.maximumf %6, %7 : vector<8x32xf32>
    %9 = tpu.concatenate %8, %1 in 1 : vector<8x32xf32>, vector<8x4xf32> -> vector<8x36xf32>
    %c0_8 = arith.constant 0 : index
    %c0_9 = arith.constant 0 : index
    %10 = vector.load %arg5[%c0_8, %c0_9] : memref<36x32xf32, #tpu.memory_space<vmem>>, vector<36x32xf32>
    %cst_10 = arith.constant dense<0.000000e+00> : vector<8x32xf32>
    %11 = tpu.matmul %9, %10, %cst_10 {dimension_numbers = #tpu.dot_dimension_numbers<[1], [0], [0], [1], [0, 0, 1, 1], [], []>} : vector<8x36xf32>, vector<36x32xf32>, vector<8x32xf32> -> vector<8x32xf32>
    %c0_11 = arith.constant 0 : index
    %c0_12 = arith.constant 0 : index
    %12 = vector.load %arg6[%c0_11, %c0_12] : memref<1x32xf32, #tpu.memory_space<vmem>>, vector<1x32xf32>
    %13 = vector.broadcast %12 : vector<1x32xf32> to vector<8x32xf32>
    %14 = arith.addf %11, %13 : vector<8x32xf32>
    %cst_13 = arith.constant 0.000000e+00 : f32
    %15 = vector.broadcast %cst_13 : f32 to vector<8x32xf32>
    %16 = arith.maximumf %14, %15 : vector<8x32xf32>
    %c0_14 = arith.constant 0 : index
    %c0_15 = arith.constant 0 : index
    %17 = vector.load %arg7[%c0_14, %c0_15] : memref<1x32xf32, #tpu.memory_space<vmem>>, vector<1x32xf32>
    %18 = vector.broadcast %17 : vector<1x32xf32> to vector<8x32xf32>
    %19 = arith.mulf %16, %18 : vector<8x32xf32>
    %cst_16 = arith.constant dense<0.000000e+00> : vector<8xf32>
    %20 = vector.multi_reduction <add>, %19, %cst_16 [1] : vector<8x32xf32> to vector<8xf32>
    %21 = vector.shape_cast %20 : vector<8xf32> to vector<8x1xf32>
    %c0_17 = arith.constant 0 : index
    %c0_18 = arith.constant 0 : index
    %22 = vector.load %arg8[%c0_17, %c0_18] : memref<1x1xf32, #tpu.memory_space<vmem>>, vector<1x1xf32>
    %23 = vector.broadcast %22 : vector<1x1xf32> to vector<8x1xf32>
    %24 = arith.addf %21, %23 : vector<8x1xf32>
    %c0_19 = arith.constant 0 : index
    %c0_20 = arith.constant 0 : index
    %25 = vector.load %arg9[%c0_19, %c0_20] : memref<8x1xf32, #tpu.memory_space<vmem>>, vector<8x1xf32>
    tpu.vector_store %arg9[%c0_19, %c0_20], %24 {strides = array<i32>} : memref<8x1xf32, #tpu.memory_space<vmem>>, vector<8x1xf32>,
    return
  }
  func.func @transform_0(%arg0: i32) -> (i32, i32) {
    %c0_i32 = arith.constant 0 : i32
    %c0_i32_0 = arith.constant 0 : i32
    return %arg0, %c0_i32 : i32, i32
  }
  func.func @transform_1(%arg0: i32) -> (i32, i32) {
    %c0_i32 = arith.constant 0 : i32
    %c0_i32_0 = arith.constant 0 : i32
    return %arg0, %c0_i32 : i32, i32
  }
  func.func @transform_2(%arg0: i32) -> (i32, i32) {
    %c0_i32 = arith.constant 0 : i32
    %c0_i32_0 = arith.constant 0 : i32
    %c0_i32_1 = arith.constant 0 : i32
    return %c0_i32, %c0_i32_0 : i32, i32
  }
  func.func @transform_3(%arg0: i32) -> (i32, i32) {
    %c0_i32 = arith.constant 0 : i32
    %c0_i32_0 = arith.constant 0 : i32
    %c0_i32_1 = arith.constant 0 : i32
    return %c0_i32, %c0_i32_0 : i32, i32
  }
  func.func @transform_4(%arg0: i32) -> (i32, i32) {
    %c0_i32 = arith.constant 0 : i32
    %c0_i32_0 = arith.constant 0 : i32
    %c0_i32_1 = arith.constant 0 : i32
    return %c0_i32, %c0_i32_0 : i32, i32
  }
  func.func @transform_5(%arg0: i32) -> (i32, i32) {
    %c0_i32 = arith.constant 0 : i32
    %c0_i32_0 = arith.constant 0 : i32
    %c0_i32_1 = arith.constant 0 : i32
    return %c0_i32, %c0_i32_0 : i32, i32
  }
  func.func @transform_6(%arg0: i32) -> (i32, i32) {
    %c0_i32 = arith.constant 0 : i32
    %c0_i32_0 = arith.constant 0 : i32
    %c0_i32_1 = arith.constant 0 : i32
    return %c0_i32, %c0_i32_0 : i32, i32
  }
  func.func @transform_7(%arg0: i32) -> (i32, i32) {
    %c0_i32 = arith.constant 0 : i32
    %c0_i32_0 = arith.constant 0 : i32
    %c0_i32_1 = arith.constant 0 : i32
    return %c0_i32, %c0_i32_0 : i32, i32
  }
  func.func @transform_8(%arg0: i32) -> (i32, i32) {
    %c0_i32 = arith.constant 0 : i32
    %c0_i32_0 = arith.constant 0 : i32
    return %arg0, %c0_i32 : i32, i32
  }
}

</mosaic_0001>

<bundles_post_ra>
// kernel: fcqv_forward.1
= control target key start
LH: loop header
LB: loop body
LE: loop exit
PB: predicated region body
PF: predicated region fallthrough
CT: control target
= control target key end

     0   :  { %vm41_vm0 = vcmask 64512   ;;  %v274_v0 = vmov 0.0   ;;  %vm275_vm1 = vmmov 0   ;;  %vm138_vm2 = vcmask 1043456   ;;  %s276_s11 = smov 32   ;;  %s363_s2 = inlined_call_operand.vmem [shape: f32[8,32], index: 2, kind: input, shape index: {}]   ;;  %s364_s0 = inlined_call_operand.vmem [shape: f32[8,8], index: 0, kind: input, shape index: {}]   ;;  %s365_s1 = inlined_call_operand.vmem [shape: f32[8,4], index: 1, kind: input, shape index: {}]   ;;  %s366_s4 = inlined_call_operand.vmem [shape: f32[36,32], index: 4, kind: input, shape index: {}]   ;;  %s367_s3 = inlined_call_operand.vmem [shape: f32[1,32], index: 3, kind: input, shape index: {}]   ;;  %s368_s7 = inlined_call_operand.<no memory space> [shape: f32[1,1], index: 7, kind: input, shape index: {}]   ;;  %s369_s5 = inlined_call_operand.vmem [shape: f32[1,32], index: 5, kind: input, shape index: {}]   ;;  %s370_s6 = inlined_call_operand.vmem [shape: f32[1,32], index: 6, kind: input, shape index: {}]   ;;  %s371_s8 = inlined_call_operand.vmem [shape: f32[8,1], index: 8, kind: output, shape index: {}]  }
   0x1   :  { %253 = vmatprep.subr.mxu0 %v274_v0  ;;  %v33_v1 = vld [vmem:[%s363_s2] sm:$0xff]  ;;  %255 = vmatprep.mubr.msk.f32.mxu0 %vm275_vm1, %v274_v0  ;;  %v125_v5 = vld [vmem:[%s366_s4 + $0x18] sm:$0xff]  ;;  %v124_v6 = vld [vmem:[%s366_s4 + $0x10] sm:$0xff]  ;;  %vm120_vm3 = vcmask 261120   ;;  %vm134_vm4 = vcmask 293888   ;;  %v13_v16 = vstv %s368_s7  ;;  %vm232_vm5 = vcmask 7168  }
   0x2   :  { %v31_v2 = vld [vmem:[%s364_s0] sm:$0xff]  ;;  %254 = vmatpush3.msra.mxu0 %v33_v1  ;;  %258 = vmatprep.subr.mxu1 %v274_v0  ;;  %v123_v7 = vld [vmem:[%s366_s4 + $0x8] sm:$0xff]  ;;  %14 = vst [vmem:[#allocation2] sm:$0x1] %v13_v16 }
   0x3   :  { %v32_v3 = vld [vmem:[%s365_s1] sm:$0xff]  ;;  %256 = vmatmul.mubr.msk.f32.vlgmr.msra.gmra.mxu0 %vm41_vm0, %v31_v2  ;;  %268 = vmatprep.mubr.msk.f32.mxu1 %vm275_vm1, %v274_v0 }
   0x4   :  { %117 = vrot.lane.b32.xlu0 %v32_v3, %s276_s11  ;;  %v126_v4 = vld [vmem:[%s366_s4 + $0x20] sm:$0xf] }
   0x5   :  { %259 = vmatpush3.msk.msra.mxu1 %vm138_vm2, %v126_v4  ;;  %v122_v8 = vld [vmem:[%s366_s4] sm:$0xff] }
   0x6   :  { %260 = vmatprep.subr.mxu1 %v274_v0  ;;  %v238_v9 = vld [vmem:[%s367_s3] ss:$0 sm:$0xff] }
   0x7   :  { %261 = vmatpush3.msra.mxu1 %v125_v5  ;;  %v240_v17 = vld [vmem:[%s369_s5] ss:$0 sm:$0xff] }
   0x8   :  { %262 = vmatprep.subr.mxu1 %v274_v0  ;;  %v243_v21 = vld [vmem:[%s370_s6] ss:$0 sm:$0xff] }
   0x9   :  { %263 = vmatpush3.msra.mxu1 %v124_v6  ;;  %v244_v25 = vld [vmem:[#allocation2] ss:$0 sm:$0xff] }
   0xa   :  { %264 = vmatprep.subr.mxu1 %v274_v0 }
   0xb   :  { %265 = vmatpush3.msra.mxu1 %v123_v7 }
   0xc   :  { %266 = vmatprep.subr.mxu1 %v274_v0 }
   0xd   :  { %267 = vmatpush3.msra.mxu1 %v122_v8 }
  0x76   :  { %v118_v13 = vpop.permute.xlu0 %117 }
  0xc3   :  { %v111_v10 = vpop.f32.mrf.mxu0 }
  0xc4   :  { %v112_v11 = vadd.f32 %v238_v9, %v111_v10 }
  0xc5   :  { %v257_v12 = vpop.f32.mrf.mxu0 }
  0xc6   :  { %v115_v14 = vmax.f32 %v112_v11, 0.0 }
  0xc8   :  { %v121_v15 = vsel %vm120_vm3, %v115_v14, %v118_v13 }
  0xc9   :  { %269 = vmatmul.mubr.msk.f32.vlgmr.msra.gmra.mxu1 %vm134_vm4, %v121_v15 }
 0x189   :  { %v208_v18 = vpop.f32.mrf.mxu1 }
 0x18a   :  { %v209_v19 = vadd.f32 %v240_v17, %v208_v18 }
 0x18b   :  { %v270_v20 = vpop.f32.mrf.mxu1 }
 0x18c   :  { %v212_v22 = vmax.f32 %v209_v19, 0.0 }
 0x18e   :  { %v220_v23 = vmul.f32 %v243_v21, %v212_v22 }
 0x190   :  { %v221_v24 = vsel %vm120_vm3, %v220_v23, 0.0 }
 0x191   :  { %222 = vadd.xlane.f32.xlu0 %v221_v24 }
 0x21a   :  { %v223_v26 = vpop.xlane.xlu0 %222 }
 0x21b   :  { %v231_v27 = vadd.f32 %v244_v25, %v223_v26 }
 0x21d   :  { %233 = vst.msk [vmem:[%s371_s8] sm:$0xff] %vm232_vm5, %v231_v27 }

</bundles_post_ra>
